<compile_context>
chip_gen: v7x
topology: tpu7x:2x2x1
jax: 0.10.0
libtpu: 0.0.40
codegen_flags: <defaults>
</compile_context>

<pallas_src>
import functools

import jax
import jax.numpy as jnp
from jax.experimental import pallas as pl
from jax.experimental.pallas import tpu as pltpu


_LANE = 128
_TARGET_BLOCK_BYTES = 4 * 1024 * 1024   # per input block (Pallas double-buffers it)
_MAX_HW_CHUNK = 4096                    # caps the in-kernel unroll at 32 VPU adds


def _pick_tiles(n, c, hw, itemsize):
    """Choose (batch_tile, hw_chunk) so blocks are lane-dense and fit VMEM."""
    tb = 8 if n >= 8 else n

    row_bytes = max(tb * c * itemsize, 1)
    budget = max(_TARGET_BLOCK_BYTES // row_bytes, _LANE)
    budget = min(budget, _MAX_HW_CHUNK)

    if hw % _LANE == 0 and hw > budget:
        # largest divisor of hw that is a multiple of 128 and <= budget
        m = hw // _LANE
        d = 1
        for cand in range(min(budget // _LANE, m), 0, -1):
            if m % cand == 0:
                d = cand
                break
        hw_chunk = d * _LANE
    else:
        # full spatial extent: always a legal block (last dim == full array dim)
        hw_chunk = hw

    # Shrink the batch tile if the (unchunkable) block is still too large
    # (keeps double-buffered footprint safe on v7x's 64 MiB VMEM).
    while tb > 1 and tb * c * hw_chunk * itemsize > 2 * _TARGET_BLOCK_BYTES:
        tb = max(tb // 2, 1)
    return tb, hw_chunk


def _gap_kernel_chunked(x_ref, o_ref, acc_ref, *, n_sub, inv_hw):
    # x_ref  : (TB, C, HW_CHUNK) block, native dtype (HW_CHUNK % 128 == 0)
    # o_ref  : (TB, C) output block, resident across the chunk axis
    # acc_ref: (TB, C, 128) f32 accumulator scratch
    k = pl.program_id(1)

    @pl.when(k == 0)
    def _():
        acc_ref[...] = jnp.zeros_like(acc_ref)

    # Per 128-lane sub-chunk: load in native dtype, upcast, elementwise add.
    # Stays on the VALU slots and overlaps with loads (no per-chunk XLU reduce).
    acc = acc_ref[...]
    for j in range(n_sub):
        acc = acc + x_ref[:, :, pl.ds(j * _LANE, _LANE)].astype(jnp.float32)
    acc_ref[...] = acc

    @pl.when(k == pl.num_programs(1) - 1)
    def _():
        s = jnp.sum(acc_ref[...], axis=-1)        # single cross-lane reduce per tile
        o_ref[...] = (s * inv_hw).astype(o_ref.dtype)


def _gap_kernel_whole(x_ref, o_ref, *, inv_hw):
    # Fallback when H*W is not a multiple of 128 (e.g. 7x7, 14x14): reduce the
    # whole (full-extent, hence legal) last dim in one shot, accumulating in f32.
    s = jnp.sum(x_ref[...].astype(jnp.float32), axis=-1)
    o_ref[...] = (s * inv_hw).astype(o_ref.dtype)


def global_avg_pool_2d(x):
    """x: (N, C, H, W) -> (N, C), mean over spatial dims."""
    n, c, h, w = x.shape
    hw = h * w
    x3 = x.reshape(n, c, hw)                       # lane-dense layout for the reduce

    itemsize = jnp.dtype(x.dtype).itemsize
    tb, hw_chunk = _pick_tiles(n, c, hw, itemsize)

    n_pad = pl.cdiv(n, tb) * tb
    if n_pad != n:                                 # zero rows reduce to zero; sliced off
        x3 = jnp.pad(x3, ((0, n_pad - n), (0, 0), (0, 0)))

    nb = n_pad // tb
    nk = hw // hw_chunk
    inv_hw = 1.0 / float(hw)

    chunked = (hw_chunk % _LANE == 0)
    if chunked:
        kernel = functools.partial(
            _gap_kernel_chunked, n_sub=hw_chunk // _LANE, inv_hw=inv_hw)
        scratch_shapes = [pltpu.VMEM((tb, c, _LANE), jnp.float32)]
        acc_bytes = tb * c * _LANE * 4
    else:
        kernel = functools.partial(_gap_kernel_whole, inv_hw=inv_hw)
        scratch_shapes = []
        acc_bytes = 0

    in_block_bytes = tb * c * hw_chunk * itemsize
    out_block_bytes = tb * c * itemsize
    needed = 2 * in_block_bytes + 2 * out_block_bytes + acc_bytes + (1 << 20)
    vmem_limit = int(min(max(needed, 16 << 20), 40 << 20))  # safe on v5e/v6e/v7x

    out = pl.pallas_call(
        kernel,
        out_shape=jax.ShapeDtypeStruct((n_pad, c), x.dtype),
        grid_spec=pltpu.PrefetchScalarGridSpec(
            num_scalar_prefetch=0,
            grid=(nb, nk),                          # reduction axis last
            in_specs=[pl.BlockSpec((tb, c, hw_chunk), lambda i, k: (i, 0, k))],
            out_specs=pl.BlockSpec((tb, c), lambda i, k: (i, 0)),
            scratch_shapes=scratch_shapes,
        ),
        compiler_params=pltpu.CompilerParams(
            dimension_semantics=("parallel", "arbitrary"),
            vmem_limit_bytes=vmem_limit,
        ),
    )(x3)

    return out[:n] if n_pad != n else out


if __name__ == "__main__":
    key = jax.random.PRNGKey(0)

    # Required small check (matches the module's expected input layout).
    x = jax.random.normal(key, (2, 4, 16, 16), dtype=jnp.float32)
    out = jax.block_until_ready(global_avg_pool_2d(x))
    ref = jnp.mean(x, axis=(2, 3))
    assert out.shape == (2, 4), out.shape
    assert jnp.allclose(out, ref, atol=1e-5, rtol=1e-5)

    # Larger check: exercises batch padding (9 -> 16), HW chunking (nk > 1),
    # and the resident-accumulator path.
    x2 = jax.random.normal(jax.random.PRNGKey(1), (9, 256, 32, 32), dtype=jnp.float32)
    out2 = jax.block_until_ready(global_avg_pool_2d(x2))
    ref2 = jnp.mean(x2, axis=(2, 3))
    assert out2.shape == (9, 256), out2.shape
    assert jnp.allclose(out2, ref2, atol=1e-4, rtol=1e-4)

    print("KERNEL_OK")
</pallas_src>

<mosaic_0001>
module attributes {stable_mosaic.version = 11 : i64} {
  func.func @_gap_kernel_chunked(%arg0: i32, %arg1: i32, %arg2: memref<2x4x256xf32, #tpu.memory_space<vmem>>, %arg3: memref<2x4xf32, #tpu.memory_space<vmem>>, %arg4: memref<2x4x128xf32, #tpu.memory_space<vmem>>) attributes {dimension_semantics = [#tpu.dimension_semantics<parallel>, #tpu.dimension_semantics<arbitrary>], iteration_bounds = array<i64: 1, 1>, scalar_prefetch = 0 : i64, scratch_operands = 1 : i64, tpu.core_type = #tpu.core_type<tc>, window_params = [{transform_indices = @transform_0, window_bounds = array<i64: 2, 4, 256>}, {transform_indices = @transform_1, window_bounds = array<i64: 2, 4>}]} {
    %c0_i32 = arith.constant 0 : i32
    %0 = arith.cmpi eq, %arg1, %c0_i32 : i32
    %1 = arith.extui %0 : i1 to i32
    %c0_i32_0 = arith.constant 0 : i32
    %2 = arith.cmpi ne, %1, %c0_i32_0 : i32
    scf.if %2 {
      %cst = arith.constant 0.000000e+00 : f32
      %12 = vector.broadcast %cst : f32 to vector<2x4x128xf32>
      %c0_13 = arith.constant 0 : index
      %c0_14 = arith.constant 0 : index
      %c0_15 = arith.constant 0 : index
      %13 = vector.load %arg4[%c0_13, %c0_14, %c0_15] : memref<2x4x128xf32, #tpu.memory_space<vmem>>, vector<2x4x128xf32>
      tpu.vector_store %arg4[%c0_13, %c0_14, %c0_15], %12 {strides = array<i32>} : memref<2x4x128xf32, #tpu.memory_space<vmem>>, vector<2x4x128xf32>,
    } else {
    }
    %c0 = arith.constant 0 : index
    %c0_1 = arith.constant 0 : index
    %c0_2 = arith.constant 0 : index
    %3 = vector.load %arg4[%c0, %c0_1, %c0_2] : memref<2x4x128xf32, #tpu.memory_space<vmem>>, vector<2x4x128xf32>
    %c0_3 = arith.constant 0 : index
    %c0_4 = arith.constant 0 : index
    %c0_5 = arith.constant 0 : index
    %4 = vector.load %arg2[%c0_3, %c0_4, %c0_5] : memref<2x4x256xf32, #tpu.memory_space<vmem>>, vector<2x4x128xf32>
    %5 = arith.addf %3, %4 : vector<2x4x128xf32>
    %c0_6 = arith.constant 0 : index
    %c0_7 = arith.constant 0 : index
    %c128 = arith.constant 128 : index
    %6 = vector.load %arg2[%c0_6, %c0_7, %c128] : memref<2x4x256xf32, #tpu.memory_space<vmem>>, vector<2x4x128xf32>
    %7 = arith.addf %5, %6 : vector<2x4x128xf32>
    %c0_8 = arith.constant 0 : index
    %c0_9 = arith.constant 0 : index
    %c0_10 = arith.constant 0 : index
    %8 = vector.load %arg4[%c0_8, %c0_9, %c0_10] : memref<2x4x128xf32, #tpu.memory_space<vmem>>, vector<2x4x128xf32>
    tpu.vector_store %arg4[%c0_8, %c0_9, %c0_10], %7 {strides = array<i32>} : memref<2x4x128xf32, #tpu.memory_space<vmem>>, vector<2x4x128xf32>,
    %c0_i32_11 = arith.constant 0 : i32
    %9 = arith.cmpi eq, %arg1, %c0_i32_11 : i32
    %10 = arith.extui %9 : i1 to i32
    %c0_i32_12 = arith.constant 0 : i32
    %11 = arith.cmpi ne, %10, %c0_i32_12 : i32
    scf.if %11 {
      %c0_13 = arith.constant 0 : index
      %c0_14 = arith.constant 0 : index
      %c0_15 = arith.constant 0 : index
      %12 = vector.load %arg4[%c0_13, %c0_14, %c0_15] : memref<2x4x128xf32, #tpu.memory_space<vmem>>, vector<2x4x128xf32>
      %cst = arith.constant dense<0.000000e+00> : vector<2x4xf32>
      %13 = vector.multi_reduction <add>, %12, %cst [2] : vector<2x4x128xf32> to vector<2x4xf32>
      %cst_16 = arith.constant 3.906250e-03 : f32
      %14 = vector.broadcast %cst_16 : f32 to vector<2x4xf32>
      %15 = arith.mulf %13, %14 : vector<2x4xf32>
      %c0_17 = arith.constant 0 : index
      %c0_18 = arith.constant 0 : index
      %16 = vector.load %arg3[%c0_17, %c0_18] : memref<2x4xf32, #tpu.memory_space<vmem>>, vector<2x4xf32>
      tpu.vector_store %arg3[%c0_17, %c0_18], %15 {strides = array<i32>} : memref<2x4xf32, #tpu.memory_space<vmem>>, vector<2x4xf32>,
    } else {
    }
    return
  }
  func.func @transform_0(%arg0: i32, %arg1: i32) -> (i32, i32, i32) {
    %c0_i32 = arith.constant 0 : i32
    %c0_i32_0 = arith.constant 0 : i32
    return %arg0, %c0_i32, %arg1 : i32, i32, i32
  }
  func.func @transform_1(%arg0: i32, %arg1: i32) -> (i32, i32) {
    %c0_i32 = arith.constant 0 : i32
    %c0_i32_0 = arith.constant 0 : i32
    return %arg0, %c0_i32 : i32, i32
  }
}

</mosaic_0001>

<bundles_post_ra>
// kernel: tpu_custom_call.1
= control target key start
LH: loop header
LB: loop body
LE: loop exit
PB: predicated region body
PF: predicated region fallthrough
CT: control target
= control target key end

     0   :  { %6 = vsyncpa [#allocation4], 0  ;;  %s179_s0 = inlined_call_operand.hbm [shape: f32[2,4,256], index: 0, kind: input, shape index: {}]   ;;  %s180_s1 = inlined_call_operand.hbm [shape: f32[2,4], index: 1, kind: output, shape index: {}]  }
   0x1   :  { %7 = vsyncpa [#allocation5], 0  ;;  %s140_s6 = smov [#allocation3]   ;;  %s92_s10 = scalar_lea.hbm %s179_s0, 256 }
   0x2   :  { %s13_s7 = sshll.u32 %s140_s6, 4  ;;  %p93_p0 = scmp.ne.s32.totalorder %s179_s0, %s92_s10  ;;  %s14_s7 = int_to_ptr.vmem [resolvable:$true] %s13_s7 }
   0x3   :  { %p96_p1 = scmp.lt.u32.totalorder %s92_s10, %s179_s0 }
   0x5   :  { %p98_p2 = pnand %p96_p1, %p93_p0 }
   0x7   :  { %101 = shalt.err (!%p98_p2)
}
   0x8   :  { %s102_s15 = scalar_lea.vmem %s14_s7, 256  ;;  %p107_p4 = scmp.lt.s32.totalorder %s14_s7, %s14_s7 }
   0x9   :  { %p103_p3 = scmp.ne.s32.totalorder %s14_s7, %s102_s15  ;;  %p108_p5 = scmp.lt.s32.totalorder %s102_s15, %s102_s15 }
   0xb   :  { %p109_p6 = por %p108_p5, %p107_p4 }
   0xd   :  { %p110_p7 = pnand %p109_p6, %p103_p3 }
   0xf   :  { %113 = shalt.err (!%p110_p7)
}
  0x10   :  { %s141_s16 = smov 128   ;;  %s142_s17 = smov 8  }
  0x11   :  { %19 = dma.hbm_to_vmem [thread:$0]  %s179_s0, 256, %s14_s7, [#allocation4], %s141_s16, %s141_s16, %s142_s17  }
  0x12   :  { %136 = dma.done.wait [#allocation4], 256  }
  0x13   :  { %137 = vsyncadd [#allocation4], 4294967040  ;;  %v143_v0 = vmov 0.0   ;;  %v31_v1 = vld [vmem:[#allocation3] sm:$0xf]  ;;  %vm46_vm0 = vcmask 1043456   ;;  %v57_v15 = vlaneseq }
  0x14   :  { %27 = vst [vmem:[#allocation2] sm:$0xf] %v143_v0  ;;  %28 = vst [vmem:[#allocation2 + $0x4] sm:$0xf] %v143_v0  ;;  %v35_v2 = vld [vmem:[#allocation3 + $0x4] sm:$0xf] }
  0x15   :  { %v32_v3 = vld [vmem:[#allocation3 + $0x8] sm:$0xf]  ;;  %v36_v6 = vld [vmem:[#allocation3 + $0xc] sm:$0xf]  ;;  %v58_v16 = vand.u32 127, %v57_v15  ;;  %v60_v17 = vshrl.u32 %v57_v15, 7 }
  0x16   :  { %s144_s0 = smov [#allocation6]   ;;  %vm67_vm1 = vcmask 1041409   ;;  %vm70_vm2 = vcmask 25600  }
  0x17   :  { %v61_v19 = vsub.s32 %v58_v16, %v60_v17  ;;  %s78_s20 = sshll.u32 %s144_s0, 4  ;;  %s79_s20 = int_to_ptr.vmem [resolvable:$true] %s78_s20 }
  0x18   :  { %s114_s21 = scalar_lea.vmem %s79_s20, 32  ;;  %p119_p9 = scmp.lt.s32.totalorder %s79_s20, %s79_s20 }
  0x19   :  { %p115_p8 = scmp.ne.s32.totalorder %s79_s20, %s114_s21  ;;  %p120_p10 = scmp.lt.s32.totalorder %s114_s21, %s114_s21 }
  0x1b   :  { %v29_v4 = vld [vmem:[#allocation2] sm:$0xf]  ;;  %v30_v5 = vld [vmem:[#allocation2 + $0x4] sm:$0xf]  ;;  %p121_p11 = por %p120_p10, %p119_p9 }
  0x1c   :  { %v33_v7 = vadd.f32 %v31_v1, %v29_v4  ;;  %v34_v8 = vadd.f32 %v32_v3, %v30_v5 }
  0x1d   :  { %p122_p12 = pnand %p121_p11, %p115_p8 }
  0x1e   :  { %v37_v9 = vadd.f32 %v35_v2, %v33_v7  ;;  %v38_v10 = vadd.f32 %v36_v6, %v34_v8 }
  0x20   :  { %39 = vst [vmem:[#allocation2] sm:$0xf] %v37_v9  ;;  %40 = vst [vmem:[#allocation2 + $0x4] sm:$0xf] %v38_v10 }
  0x27   :  { %v44_v11 = vld [vmem:[#allocation2] sm:$0xf]  ;;  %v45_v12 = vld [vmem:[#allocation2 + $0x4] sm:$0xf] }
  0x28   :  { %v47_v13 = vsel %vm46_vm0, %v44_v11, 0.0  ;;  %v50_v14 = vsel %vm46_vm0, %v45_v12, 0.0 }
  0x29   :  { %48 = vadd.xlane.f32.xlu0 %v47_v13 }
  0x2d   :  { %51 = vadd.xlane.f32.xlu0 %v50_v14 }
  0xb6   :  { %v49_v18 = vpop.xlane.xlu0 %48 }
  0xb7   :  { %v53_v20 = vmul.f32 0.00390625, %v49_v18 }
  0xb9   :  { %v62_v23 = vrot.slane %v53_v20, %v61_v19 }
  0xba   :  { %v52_v21 = vpop.xlane.xlu0 %51 }
  0xbb   :  { %v54_v22 = vmul.f32 0.00390625, %v52_v21 }
  0xbd   :  { %v66_v24 = vrot.slane %v54_v22, %v61_v19 }
  0xbf   :  { %v68_v25 = vsel %vm67_vm1, %v66_v24, %v62_v23 }
  0xc0   :  { %71 = vst.msk [vmem:[#allocation6] sm:$0x3] %vm70_vm2, %v68_v25 }
  0xc1   :  { %125 = shalt.err (!%p122_p12)
}
  0xc2   :  { %s126_s24 = scalar_lea.hbm %s180_s1, 32 }
  0xc3   :  { %p127_p13 = scmp.ne.s32.totalorder %s180_s1, %s126_s24  ;;  %p130_p0 = scmp.lt.u32.totalorder %s126_s24, %s180_s1 }
  0xc5   :  { %p132_p1 = pnand %p130_p0, %p127_p13 }
  0xc7   :  { %135 = shalt.err (!%p132_p1)
}
  0xc8   :  { %81 = dma.vmem_to_hbm [thread:$0]  %s79_s20, 32, %s180_s1, [#allocation5]  }
  0xc9   :  { %138 = dma.done.wait [#allocation5], 32  }
  0xca   :  { %139 = vsyncadd [#allocation5], 4294967264 }
  0xcb   :  { %85 = vsyncpa [#allocation4], 1 }
  0xcc   :  { %86 = vsyncpa [#allocation5], 1 }

</bundles_post_ra>
